<compile_context>
chip_gen: v5e
topology: v5e:2x2
jax: 0.10.0
libtpu: 0.0.40
codegen_flags: <defaults>
</compile_context>

<pallas_src>
from functools import partial

import jax
import jax.numpy as jnp
from jax import lax
from jax.experimental import pallas as pl
from jax.experimental.pallas import tpu as pltpu


def _mlp_kernel(x_ref, w1_ref, w2_ref, b_ref, o_ref):
    # x:  [tb, D_in]  bf16 (natural layout; batch on sublanes)
    # w1: [H, D_in]   bf16 (PyTorch [out, in] layout)
    # w2: [D_out, H]  bf16
    # b:  [2, H]      f32  (row 0 = b1; row 1 = b2 zero-padded to H)
    # o:  [tb, D_out] bf16
    d_out = o_ref.shape[1]

    # Linear 1: contraction over D_in on the LAST dim of both operands
    # (x @ W1.T) -- no HBM/VMEM transpose is materialized.
    h32 = lax.dot_general(
        x_ref[...], w1_ref[...],
        dimension_numbers=(((1,), (1,)), ((), ())),
        preferred_element_type=jnp.float32)                 # [tb, H] f32 (MXU)

    b = b_ref[...]                                          # [2, H] f32
    b1 = b[0:1, :].astype(jnp.bfloat16)                     # [1, H] bf16
    b2 = b[1:2, :d_out]                                     # [1, D_out] f32

    # bf16 epilogue: single cast of the f32 accumulate, then bf16 add/max on
    # the VPU (halves the intermediate's vreg/VMEM traffic).
    h = jnp.maximum(h32.astype(jnp.bfloat16) + b1, 0)       # [tb, H] bf16

    # Linear 2: contraction over H (h @ W2.T), f32 accumulation on the MXU.
    y = lax.dot_general(
        h, w2_ref[...],
        dimension_numbers=(((1,), (1,)), ((), ())),
        preferred_element_type=jnp.float32)                 # [tb, D_out] f32

    o_ref[...] = (y + b2).astype(o_ref.dtype)


def _pick_tb(batch):
    """Adaptive batch tile.

    Small batches: one block (drops per-step pipeline overhead entirely).
    Large batches: multiple of 128, sized for >= ~8 grid steps so the
    auto-pipeliner reaches steady state (and v7x's two TensorCores each get
    several blocks), capped so the per-step working set stays tiny vs VMEM.
    """
    if batch <= 1024:
        return batch
    tb = -(-batch // 8)                       # cdiv(batch, 8)
    tb = ((tb + 127) // 128) * 128            # lane/sublane friendly
    return min(tb, 4096)


@partial(jax.jit, static_argnames=("tb",))
def ddp_mlp_forward(x, w1, b1, w2, b2, *, tb=None):
    """Forward of the DDP-wrapped MLP: relu(x @ w1.T + b1) @ w2.T + b2.

    x: [B, D_in]; w1: [H, D_in]; b1: [H]; w2: [D_out, H]; b2: [D_out].
    Returns [B, D_out] in bf16 (bf16 MXU operands, f32 accumulation).
    """
    B, D_in = x.shape
    H = w1.shape[0]
    D_out = w2.shape[0]

    # Pin the bf16 pipeline regardless of caller dtype (avoids silent f32
    # promotion that would double the x DMA and leave the bf16 MXU path).
    x = x.astype(jnp.bfloat16)
    w1 = w1.astype(jnp.bfloat16)
    w2 = w2.astype(jnp.bfloat16)

    # Merge both biases into a single tiny f32 operand: one DMA / index_map.
    b = jnp.zeros((2, H), jnp.float32)
    b = b.at[0, :].set(b1.astype(jnp.float32).reshape(-1))
    b = b.at[1, :D_out].set(b2.astype(jnp.float32).reshape(-1))

    if tb is None:
        tb = _pick_tb(B)

    # Pad the batch so every block is full: full-tile DMAs and unmasked
    # stores (a ragged last block would fall back to masked partial stores).
    B_pad = pl.cdiv(B, tb) * tb
    if B_pad != B:
        x = jnp.pad(x, ((0, B_pad - B), (0, 0)))
    grid = (B_pad // tb,)

    cost = pl.CostEstimate(
        flops=2 * B_pad * H * (D_in + D_out),
        transcendentals=0,
        bytes_accessed=(x.size * 2 + B_pad * D_out * 2
                        + (w1.size + w2.size) * 2 + b.size * 4),
    )

    out = pl.pallas_call(
        _mlp_kernel,
        out_shape=jax.ShapeDtypeStruct((B_pad, D_out), jnp.bfloat16),
        grid=grid,
        in_specs=[
            pl.BlockSpec((tb, D_in), lambda i: (i, 0)),     # x streams over batch
            pl.BlockSpec((H, D_in), lambda i: (0, 0)),      # weights VMEM-resident
            pl.BlockSpec((D_out, H), lambda i: (0, 0)),
            pl.BlockSpec((2, H), lambda i: (0, 0)),         # merged biases
        ],
        out_specs=pl.BlockSpec((tb, D_out), lambda i: (i, 0)),
        compiler_params=pltpu.CompilerParams(
            dimension_semantics=("parallel",)),             # v7x megacore shard
        cost_estimate=cost,
    )(x, w1, w2, b)

    return out[:B] if B_pad != B else out


class DDPIndividualParametersPallas:
    """Mimics DDPIndividualParameters: forward == wrapped module's forward.

    Parameter broadcast from rank 0 is emulated by deterministic single-source
    initialization (every "rank" derives identical params from PRNGKey(0)).
    """

    def __init__(self, params):
        # TODO(synk): dist.broadcast of params and dist.all_reduce of grads
        # are multi-device collectives outside the forward pass; not
        # implemented in this single-device kernel.
        self.params = params
        self._grad_sync_pending = False

    def __call__(self, x):
        self._grad_sync_pending = True
        w1, b1, w2, b2 = self.params
        return ddp_mlp_forward(x, w1, b1, w2, b2)

    def parameters(self):
        return iter(self.params)

    def finish_gradient_synchronization(self):
        self._grad_sync_pending = False


def _init_params(key, d_in=32, hidden=64, d_out=16):
    """Deterministic PyTorch-Linear-style init in [out, in] layout (f32)."""
    k1, k2, k3, k4 = jax.random.split(key, 4)
    bound1 = 1.0 / (d_in ** 0.5)
    bound2 = 1.0 / (hidden ** 0.5)
    w1 = jax.random.uniform(k1, (hidden, d_in), jnp.float32, -bound1, bound1)
    b1 = jax.random.uniform(k2, (hidden,), jnp.float32, -bound1, bound1)
    w2 = jax.random.uniform(k3, (d_out, hidden), jnp.float32, -bound2, bound2)
    b2 = jax.random.uniform(k4, (d_out,), jnp.float32, -bound2, bound2)
    return (w1, b1, w2, b2)


def _mlp_ref(x, w1, b1, w2, b2):
    """Plain-JAX reference with the same dtype strategy as the kernel."""
    xb = x.astype(jnp.bfloat16)
    w1b = w1.astype(jnp.bfloat16)
    w2b = w2.astype(jnp.bfloat16)
    h32 = lax.dot_general(xb, w1b, (((1,), (1,)), ((), ())),
                          preferred_element_type=jnp.float32)
    h = jnp.maximum(h32.astype(jnp.bfloat16)
                    + b1.astype(jnp.bfloat16).reshape(1, -1), 0)
    y = lax.dot_general(h, w2b, (((1,), (1,)), ((), ())),
                        preferred_element_type=jnp.float32)
    return (y + b2.astype(jnp.float32).reshape(1, -1)).astype(jnp.bfloat16)


if __name__ == "__main__":
    key = jax.random.PRNGKey(0)
    k_param, k_x, k_x2 = jax.random.split(key, 3)

    D_IN, HIDDEN, D_OUT = 32, 64, 16
    params = _init_params(k_param, D_IN, HIDDEN, D_OUT)
    model = DDPIndividualParametersPallas(params)

    # Small demo shape: single block, no grid / pipeline overhead.
    B = 8
    x = jax.random.normal(k_x, (B, D_IN), jnp.float32)
    out = jax.block_until_ready(model(x))
    ref = _mlp_ref(x, *params)
    assert out.shape == (B, D_OUT)
    err = float(jnp.max(jnp.abs(out.astype(jnp.float32) - ref.astype(jnp.float32))))
    assert err < 2e-2, f"max abs err (small batch) {err}"

    # Larger batch: exercises the batch-tiled path (8 grid steps of 256 rows).
    B2 = 2048
    x2 = jax.random.normal(k_x2, (B2, D_IN), jnp.float32)
    out2 = jax.block_until_ready(model(x2))
    ref2 = _mlp_ref(x2, *params)
    assert out2.shape == (B2, D_OUT)
    err2 = float(jnp.max(jnp.abs(out2.astype(jnp.float32) - ref2.astype(jnp.float32))))
    assert err2 < 2e-2, f"max abs err (tiled batch) {err2}"

    print("KERNEL_OK")
</pallas_src>

<mosaic_0001>
module attributes {stable_mosaic.version = 11 : i64} {
  func.func @_mlp_kernel(%arg0: i32, %arg1: memref<8x32xbf16, #tpu.memory_space<vmem>>, %arg2: memref<64x32xbf16, #tpu.memory_space<vmem>>, %arg3: memref<16x64xbf16, #tpu.memory_space<vmem>>, %arg4: memref<2x64xf32, #tpu.memory_space<vmem>>, %arg5: memref<8x16xbf16, #tpu.memory_space<vmem>>) attributes {dimension_semantics = [#tpu.dimension_semantics<parallel>], iteration_bounds = array<i64: 1>, scalar_prefetch = 0 : i64, scratch_operands = 0 : i64, tpu.core_type = #tpu.core_type<tc>, window_params = [{transform_indices = @transform_0, window_bounds = array<i64: 8, 32>}, {pipeline_mode = #tpu.pipeline_mode<synchronous>, transform_indices = @transform_1, window_bounds = array<i64: 64, 32>}, {pipeline_mode = #tpu.pipeline_mode<synchronous>, transform_indices = @transform_2, window_bounds = array<i64: 16, 64>}, {pipeline_mode = #tpu.pipeline_mode<synchronous>, transform_indices = @transform_3, window_bounds = array<i64: 2, 64>}, {transform_indices = @transform_4, window_bounds = array<i64: 8, 16>}]} {
    %c0 = arith.constant 0 : index
    %c0_0 = arith.constant 0 : index
    %0 = vector.load %arg1[%c0, %c0_0] : memref<8x32xbf16, #tpu.memory_space<vmem>>, vector<8x32xbf16>
    %c0_1 = arith.constant 0 : index
    %c0_2 = arith.constant 0 : index
    %1 = vector.load %arg2[%c0_1, %c0_2] : memref<64x32xbf16, #tpu.memory_space<vmem>>, vector<64x32xbf16>
    %cst = arith.constant dense<0.000000e+00> : vector<8x64xf32>
    %2 = tpu.matmul %0, %1, %cst {dimension_numbers = #tpu.dot_dimension_numbers<[1], [1], [0], [0], [0, 0, 1, 0], [], []>} : vector<8x32xbf16>, vector<64x32xbf16>, vector<8x64xf32> -> vector<8x64xf32>
    %c0_3 = arith.constant 0 : index
    %c0_4 = arith.constant 0 : index
    %3 = vector.load %arg4[%c0_3, %c0_4] : memref<2x64xf32, #tpu.memory_space<vmem>>, vector<2x64xf32>
    %4 = vector.extract_strided_slice %3 {offsets = [0, 0], sizes = [1, 64], strides = [1, 1]} : vector<2x64xf32> to vector<1x64xf32>
    %5 = arith.truncf %4 : vector<1x64xf32> to vector<1x64xbf16>
    %6 = vector.extract_strided_slice %3 {offsets = [1, 0], sizes = [1, 16], strides = [1, 1]} : vector<2x64xf32> to vector<1x16xf32>
    %7 = arith.truncf %2 : vector<8x64xf32> to vector<8x64xbf16>
    %8 = vector.broadcast %5 : vector<1x64xbf16> to vector<8x64xbf16>
    %9 = arith.addf %7, %8 : vector<8x64xbf16>
    %cst_5 = arith.constant 0.000000e+00 : bf16
    %10 = vector.broadcast %cst_5 : bf16 to vector<8x64xbf16>
    %11 = arith.maximumf %9, %10 : vector<8x64xbf16>
    %c0_6 = arith.constant 0 : index
    %c0_7 = arith.constant 0 : index
    %12 = vector.load %arg3[%c0_6, %c0_7] : memref<16x64xbf16, #tpu.memory_space<vmem>>, vector<16x64xbf16>
    %cst_8 = arith.constant dense<0.000000e+00> : vector<8x16xf32>
    %13 = tpu.matmul %11, %12, %cst_8 {dimension_numbers = #tpu.dot_dimension_numbers<[1], [1], [0], [0], [0, 0, 1, 0], [], []>} : vector<8x64xbf16>, vector<16x64xbf16>, vector<8x16xf32> -> vector<8x16xf32>
    %14 = vector.broadcast %6 : vector<1x16xf32> to vector<8x16xf32>
    %15 = arith.addf %13, %14 : vector<8x16xf32>
    %16 = arith.truncf %15 : vector<8x16xf32> to vector<8x16xbf16>
    %c0_9 = arith.constant 0 : index
    %c0_10 = arith.constant 0 : index
    %17 = vector.load %arg5[%c0_9, %c0_10] : memref<8x16xbf16, #tpu.memory_space<vmem>>, vector<8x16xbf16>
    tpu.vector_store %arg5[%c0_9, %c0_10], %16 {strides = array<i32>} : memref<8x16xbf16, #tpu.memory_space<vmem>>, vector<8x16xbf16>,
    return
  }
  func.func @transform_0(%arg0: i32) -> (i32, i32) {
    %c0_i32 = arith.constant 0 : i32
    %c0_i32_0 = arith.constant 0 : i32
    return %arg0, %c0_i32 : i32, i32
  }
  func.func @transform_1(%arg0: i32) -> (i32, i32) {
    %c0_i32 = arith.constant 0 : i32
    %c0_i32_0 = arith.constant 0 : i32
    %c0_i32_1 = arith.constant 0 : i32
    return %c0_i32, %c0_i32_0 : i32, i32
  }
  func.func @transform_2(%arg0: i32) -> (i32, i32) {
    %c0_i32 = arith.constant 0 : i32
    %c0_i32_0 = arith.constant 0 : i32
    %c0_i32_1 = arith.constant 0 : i32
    return %c0_i32, %c0_i32_0 : i32, i32
  }
  func.func @transform_3(%arg0: i32) -> (i32, i32) {
    %c0_i32 = arith.constant 0 : i32
    %c0_i32_0 = arith.constant 0 : i32
    %c0_i32_1 = arith.constant 0 : i32
    return %c0_i32, %c0_i32_0 : i32, i32
  }
  func.func @transform_4(%arg0: i32) -> (i32, i32) {
    %c0_i32 = arith.constant 0 : i32
    %c0_i32_0 = arith.constant 0 : i32
    return %arg0, %c0_i32 : i32, i32
  }
}

</mosaic_0001>

<bundles_post_ra>
// kernel: ddp_mlp_forward.1
= control target key start
LH: loop header
LB: loop body
LE: loop exit
PB: predicated region body
PF: predicated region fallthrough
CT: control target
= control target key end

     0   :  { %vm48_vm0 = vcmask 261120   ;;  %s242_s0 = inlined_call_operand.vmem [shape: bf16[8,32], index: 0, kind: input, shape index: {}]   ;;  %s243_s1 = inlined_call_operand.vmem [shape: bf16[64,32], index: 1, kind: input, shape index: {}]   ;;  %s244_s2 = inlined_call_operand.vmem [shape: bf16[16,64], index: 2, kind: input, shape index: {}]   ;;  %s245_s3 = inlined_call_operand.vmem [shape: f32[2,64], index: 3, kind: input, shape index: {}]   ;;  %s246_s4 = inlined_call_operand.hbm [shape: bf16[8,16], index: 4, kind: output, shape index: {}]  }
   0x1   :  { %v163_v0 = vld [vmem:[%s243_s1 + $0x18] sm:$0xff] }
   0x2   :  { %9 = vsyncpa [#allocation3], 0  ;;  %v62_v1 = vsel %vm48_vm0, %v163_v0, 0  ;;  %v162_v2 = vld [vmem:[%s243_s1 + $0x10] sm:$0xff]  ;;  %v161_v4 = vld [vmem:[%s243_s1 + $0x8] sm:$0xff]  ;;  %vm99_vm1 = vcmask 523264  }
   0x3   :  { %68 = vmatpush.bf16.xpose.msra.mxu0 %v62_v1  ;;  %v59_v3 = vsel %vm48_vm0, %v162_v2, 0  ;;  %v56_v5 = vsel %vm48_vm0, %v161_v4, 0  ;;  %v160_v6 = vld [vmem:[%s243_s1] sm:$0xff]  ;;  %vm120_vm2 = vcmask 125952  }
   0x4   :  { %v53_v7 = vsel %vm48_vm0, %v160_v6, 0  ;;  %v19_v8 = vld [vmem:[%s242_s0] sm:$0xf]  ;;  %s192_s0 = smov [#allocation2]  }
   0x5   :  { %v164_v9 = vld [vmem:[%s244_s2] sm:$0xff]  ;;  %s127_s1 = sshll.u32 %s192_s0, 4  ;;  %s128_s1 = int_to_ptr.vmem [resolvable:$true] %s127_s1 }
   0x6   :  { %v104_v10 = vsel %vm99_vm1, %v164_v9, 0  ;;  %v77_v11 = vld [vmem:[%s245_s3] sm:$0x3]  ;;  %s129_s3 = sshll.u32 %s246_s4, 4  ;;  %s130_s3 = int_to_ptr.hbm [resolvable:$true] %s129_s3 }
   0x7   :  { %113 = vmatpush.bf16.xpose.msra.mxu1 %v104_v10  ;;  %v78_v12 = vpack.c.bf16 %v77_v11, %v77_v11  ;;  %v93_v23 = vperm.slane %v77_v11, 1 }
   0x9   :  { %v81_v13 = vpack.i.b16 %v78_v12, %v78_v12 }
   0xb   :  { %69 = vmatpush.bf16.xpose.msra.mxu0 %v59_v3  ;;  %v83_v14 = vperm.slane %v81_v13, 0 }
   0xd   :  { %v85_v17 = vunpack.c.l.bf16 %v83_v14 }
  0x13   :  { %70 = vmatpush.bf16.xpose.msra.mxu0 %v56_v5 }
  0x1b   :  { %71 = vmatpush.bf16.xpose.msra.mxu0 %v53_v7 }
  0x22   :  { %154 = vmatmul.msk.bf16.vlgmr.msra.gmra.mxu0 %vm48_vm0, %v19_v8 }
  0x9f   :  { %v73_v15 = vpop.f32.mrf.mxu0 }
  0xa0   :  { %v79_v16 = vpack.c.bf16 %v73_v15, %v73_v15 }
  0xa2   :  { %v84_v18 = vunpack.c.l.bf16 %v79_v16 }
  0xa4   :  { %v86_v19 = vadd.f32 %v85_v17, %v84_v18 }
  0xa6   :  { %v89_v20 = vmax.f32 %v86_v19, 0.0 }
  0xa7   :  { %v75_v21 = vpop.f32.mrf.mxu0 }
  0xa8   :  { %v90_v22 = vpack.c.bf16 %v89_v20, %v89_v20 }
  0xaa   :  { %159 = vmatmul.msk.bf16.vlgmr.msra.gmra.mxu1 %vm99_vm1, %v90_v22 }
 0x127   :  { %v115_v24 = vpop.f32.mrf.mxu1 }
 0x128   :  { %v116_v25 = vadd.f32 %v115_v24, %v93_v23 }
 0x12a   :  { %v119_v26 = vpack.c.bf16 %v116_v25, %v116_v25 }
 0x12c   :  { %121 = vst.msk [vmem:[#allocation2] sm:$0xf] %vm120_vm2, %v119_v26 }
 0x12d   :  { %132 = dma.vmem_to_hbm [thread:$0]  %s128_s1, 64, %s130_s3, [#allocation3]  }
 0x12f   :  { %v117_v27 = vpop.f32.mrf.mxu1 }
 0x130   :  { %190 = dma.done.wait [#allocation3], 64  }
 0x131   :  { %191 = vsyncadd [#allocation3], 4294967232 }
 0x132   :  { %137 = vsyncpa [#allocation3], 1 }

</bundles_post_ra>
